<compile_context>
chip_gen: v5e
topology: v5e:2x2
jax: 0.10.0
libtpu: 0.0.40
codegen_flags: <defaults>
</compile_context>

<pallas_src>
import functools

import numpy as np
import jax
import jax.numpy as jnp
from jax.experimental import pallas as pl
from jax.experimental.pallas import tpu as pltpu

LANE = 128
SUBLANE = 8


def _round_up(x, m):
    return (x + m - 1) // m * m


def _pad2(a, rows, cols, dtype):
    out = jnp.zeros((rows, cols), dtype)
    return out.at[: a.shape[0], : a.shape[1]].set(a.astype(dtype))


# ---------------------------------------------------------------------------
# Pallas kernels
# ---------------------------------------------------------------------------
def _sage_conv_kernel(adj_ref, xk_ref, xi_ref, wl_ref, wr_ref, bl_ref,
                      out_ref, acc_ref, *, apply_relu: bool):
    """Tiled SAGEConv: out[i] = (sum_k adj[i,k] @ x[k]) @ W_l + x[i] @ W_r + b_l."""
    k = pl.program_id(1)

    @pl.when(k == 0)
    def _():
        acc_ref[...] = jnp.zeros_like(acc_ref)

    # Dominant N^2 work: mean aggregation over neighbours, bf16 MXU matmul with
    # f32 accumulation, tiled along the K (neighbour) axis.
    acc_ref[...] += jnp.dot(adj_ref[...], xk_ref[...],
                            preferred_element_type=jnp.float32)

    @pl.when(k == pl.num_programs(1) - 1)
    def _():
        # Weight transforms only once per row tile (reduction epilogue).
        agg = acc_ref[...].astype(wl_ref.dtype)
        out = jnp.dot(agg, wl_ref[...], preferred_element_type=jnp.float32)
        out += jnp.dot(xi_ref[...], wr_ref[...],
                       preferred_element_type=jnp.float32)
        out += bl_ref[...].astype(jnp.float32)
        if apply_relu:
            out = jnp.maximum(out, 0.0)
        out_ref[...] = out.astype(out_ref.dtype)


def _head_kernel(xs_ref, xd_ref, w1_ref, b1_ref, w2_ref, b2_ref, out_ref):
    """Link head: h = x_src * x_dst; out = lin2(relu(lin1(h)))."""
    h = xs_ref[...] * xd_ref[...]                               # [G, Hp] bf16
    h1 = jnp.dot(h, w1_ref[...], preferred_element_type=jnp.float32)
    h1 += b1_ref[...]
    h1 = jnp.maximum(h1, 0.0)
    # dropout: identity (inference / training=False)
    # Final [H,1] projection as a lane reduction (VPU/XLU) — avoids a
    # degenerate 1-column MXU matmul with a fully-masked result store.
    out_ref[...] = jnp.sum(h1 * w2_ref[...], axis=-1, keepdims=True) + b2_ref[...]


_VMEM_SPEC = pl.BlockSpec(memory_space=pltpu.MemorySpace.VMEM)


def sage_conv(x, adj, wl, wr, bl, *, apply_relu, tm, tk):
    """One SAGEConv layer over padded, bf16 operands."""
    n, c = x.shape
    h = wl.shape[1]
    assert n % tm == 0 and n % tk == 0

    kernel = functools.partial(_sage_conv_kernel, apply_relu=apply_relu)

    def nbytes(shape, dt):
        return int(np.prod(shape)) * jnp.dtype(dt).itemsize

    # Double-buffered input/output tiles + f32 accumulator, with 2x headroom.
    vmem = 2 * (nbytes((tm, tk), x.dtype) + nbytes((tk, c), x.dtype)
                + nbytes((tm, c), x.dtype) + 2 * nbytes((c, h), x.dtype)
                + nbytes((1, h), x.dtype) + nbytes((tm, h), x.dtype))
    vmem += nbytes((tm, c), jnp.float32)
    vmem_limit = int(min(max(2 * vmem, 8 * 1024 * 1024), 48 * 1024 * 1024))

    flops = 2 * n * n * c + 2 * 2 * n * c * h
    bytes_accessed = (nbytes((n, n), x.dtype) + 2 * nbytes((n, c), x.dtype)
                      + 2 * nbytes((c, h), x.dtype) + nbytes((n, h), x.dtype))

    return pl.pallas_call(
        kernel,
        out_shape=jax.ShapeDtypeStruct((n, h), x.dtype),
        grid_spec=pltpu.PrefetchScalarGridSpec(
            num_scalar_prefetch=0,
            grid=(n // tm, n // tk),
            in_specs=[
                pl.BlockSpec((tm, tk), lambda i, k: (i, k)),   # adj tile
                pl.BlockSpec((tk, c), lambda i, k: (k, 0)),    # x rows (neighbour)
                pl.BlockSpec((tm, c), lambda i, k: (i, 0)),    # x rows (root term)
                pl.BlockSpec((c, h), lambda i, k: (0, 0)),     # W_l (resident)
                pl.BlockSpec((c, h), lambda i, k: (0, 0)),     # W_r (resident)
                pl.BlockSpec((1, h), lambda i, k: (0, 0)),     # b_l
            ],
            out_specs=pl.BlockSpec((tm, h), lambda i, k: (i, 0)),
            scratch_shapes=[pltpu.VMEM((tm, c), jnp.float32)],
        ),
        compiler_params=pltpu.CompilerParams(
            dimension_semantics=("parallel", "arbitrary"),
            vmem_limit_bytes=vmem_limit,
        ),
        cost_estimate=pl.CostEstimate(flops=flops, transcendentals=0,
                                      bytes_accessed=bytes_accessed),
    )(adj, x, x, wl, wr, bl)


def link_head(xs, xd, w1, b1, w2, b2):
    g = xs.shape[0]
    return pl.pallas_call(
        _head_kernel,
        out_shape=jax.ShapeDtypeStruct((g, 1), jnp.float32),
        in_specs=[_VMEM_SPEC] * 6,
        out_specs=_VMEM_SPEC,
    )(xs, xd, w1, b1, w2, b2)


# ---------------------------------------------------------------------------
# Input / parameter preparation (padding + bf16 cast), shared by kernel & ref
# ---------------------------------------------------------------------------
def prepare(params, z, edge_index, x_feat, compute_dtype=jnp.bfloat16):
    n = z.shape[0]
    hidden = params["z_emb"].shape[1]
    c_in = hidden + x_feat.shape[1]

    tile = 256 if n > 256 else 128
    n_pad = _round_up(max(n, tile), tile)
    c_pad = _round_up(max(c_in, hidden), LANE)   # single padded width end-to-end
    h_pad = c_pad

    # Embedding lookup + feature concat (glue), zero-padded to lane-dense width.
    z_emb = jnp.take(params["z_emb"], z, axis=0)
    x0 = jnp.concatenate([z_emb, x_feat.astype(jnp.float32)], axis=1)
    x_p = jnp.zeros((n_pad, c_pad), compute_dtype)
    x_p = x_p.at[:n, :c_in].set(x0.astype(compute_dtype))

    # Dense row-normalized adjacency for mean aggregation (glue).
    src, dst = edge_index[0], edge_index[1]
    adj = jnp.zeros((n_pad, n_pad), jnp.float32).at[dst, src].add(1.0)
    deg = adj.sum(axis=1, keepdims=True)
    adj_norm = jnp.where(deg > 0, adj / jnp.maximum(deg, 1.0), 0.0)
    adj_p = adj_norm.astype(compute_dtype)

    convs_p = []
    for conv in params["convs"]:
        convs_p.append({
            "wl": _pad2(conv["wl"], c_pad, h_pad, compute_dtype),
            "wr": _pad2(conv["wr"], c_pad, h_pad, compute_dtype),
            "bl": _pad2(conv["bl"], 1, h_pad, compute_dtype),
        })

    head_p = {
        "w1": _pad2(params["w1"], h_pad, h_pad, compute_dtype),
        "b1": _pad2(params["b1"], 1, h_pad, jnp.float32),
        "w2": _pad2(params["w2"].T, 1, h_pad, jnp.float32),   # row vector
        "b2": params["b2"].astype(jnp.float32),
    }
    return {"x": x_p, "adj": adj_p, "convs": convs_p, "head": head_p,
            "n": n, "n_pad": n_pad, "tile": tile, "h_pad": h_pad}


def _center_indices(batch_np):
    _, ci = np.unique(batch_np, return_index=True)
    return jnp.asarray(ci, jnp.int32)


# ---------------------------------------------------------------------------
# SEALSAGE forward (glue in plain JAX, hot path in Pallas)
# ---------------------------------------------------------------------------
def seal_sage_forward(params, z, edge_index, batch_np, x_feat):
    prep = prepare(params, z, edge_index, x_feat)
    x, adj, tile = prep["x"], prep["adj"], prep["tile"]

    num_layers = len(prep["convs"])
    for li, cv in enumerate(prep["convs"]):
        x = sage_conv(x, adj, cv["wl"], cv["wr"], cv["bl"],
                      apply_relu=(li < num_layers - 1), tm=tile, tk=tile)
        # dropout: identity (inference / training=False)

    ci = _center_indices(batch_np)
    g = ci.shape[0]
    g_pad = _round_up(max(g, SUBLANE), SUBLANE)
    xs = jnp.zeros((g_pad, x.shape[1]), x.dtype).at[:g].set(jnp.take(x, ci, axis=0))
    xd = jnp.zeros((g_pad, x.shape[1]), x.dtype).at[:g].set(jnp.take(x, ci + 1, axis=0))

    hp = prep["head"]
    out = link_head(xs, xd, hp["w1"], hp["b1"], hp["w2"], hp["b2"])
    return out[:g]


# ---------------------------------------------------------------------------
# Pure-JAX reference (same padded bf16 operands, same f32 accumulation)
# ---------------------------------------------------------------------------
def seal_sage_reference(params, z, edge_index, batch_np, x_feat):
    prep = prepare(params, z, edge_index, x_feat)
    x, adj = prep["x"], prep["adj"]
    num_layers = len(prep["convs"])
    for li, cv in enumerate(prep["convs"]):
        agg = jnp.dot(adj, x, preferred_element_type=jnp.float32)
        out = jnp.dot(agg.astype(x.dtype), cv["wl"],
                      preferred_element_type=jnp.float32)
        out += jnp.dot(x, cv["wr"], preferred_element_type=jnp.float32)
        out += cv["bl"].astype(jnp.float32)
        if li < num_layers - 1:
            out = jnp.maximum(out, 0.0)
        x = out.astype(prep["x"].dtype)

    ci = _center_indices(batch_np)
    xs = jnp.take(x, ci, axis=0)
    xd = jnp.take(x, ci + 1, axis=0)
    hp = prep["head"]
    h = xs * xd
    h1 = jnp.maximum(jnp.dot(h, hp["w1"], preferred_element_type=jnp.float32)
                     + hp["b1"], 0.0)
    return jnp.sum(h1 * hp["w2"], axis=-1, keepdims=True) + hp["b2"]


# ---------------------------------------------------------------------------
# Deterministic parameter / input construction
# ---------------------------------------------------------------------------
def make_params(key, hidden, num_layers, max_z, num_features):
    keys = jax.random.split(key, 4 + 3 * num_layers)
    params = {"z_emb": jax.random.normal(keys[0], (max_z, hidden), jnp.float32)}
    convs = []
    in_c = hidden + num_features
    ki = 1
    for _ in range(num_layers):
        scale = 1.0 / np.sqrt(in_c)
        convs.append({
            "wl": jax.random.normal(keys[ki], (in_c, hidden), jnp.float32) * scale,
            "bl": jnp.zeros((1, hidden), jnp.float32),
            "wr": jax.random.normal(keys[ki + 1], (in_c, hidden), jnp.float32) * scale,
        })
        ki += 2
        in_c = hidden
    params["convs"] = convs
    s1 = 1.0 / np.sqrt(hidden)
    params["w1"] = jax.random.normal(keys[ki], (hidden, hidden), jnp.float32) * s1
    params["b1"] = jnp.zeros((1, hidden), jnp.float32)
    params["w2"] = jax.random.normal(keys[ki + 1], (hidden, 1), jnp.float32) * s1
    params["b2"] = jnp.zeros((1, 1), jnp.float32)
    return params


if __name__ == "__main__":
    hidden_channels = 32
    num_layers = 3
    max_z = 10
    num_features = 8
    nodes_per_graph = 8
    num_graphs = 2
    N = nodes_per_graph * num_graphs

    key = jax.random.PRNGKey(0)
    k_param, k_z, k_feat = jax.random.split(key, 3)

    params = make_params(k_param, hidden_channels, num_layers, max_z, num_features)

    # Node structural labels z (DRNL labels), node features, graph assignment.
    z = jax.random.randint(k_z, (N,), 0, max_z, jnp.int32)
    x_feat = jax.random.normal(k_feat, (N, num_features), jnp.float32)
    batch_np = np.repeat(np.arange(num_graphs), nodes_per_graph)

    # Bidirectional chain within each graph.
    srcs, dsts = [], []
    for g in range(num_graphs):
        off = g * nodes_per_graph
        for i in range(nodes_per_graph - 1):
            srcs += [off + i, off + i + 1]
            dsts += [off + i + 1, off + i]
    edge_index = jnp.asarray(np.stack([srcs, dsts]), jnp.int32)   # [2, E]

    out = seal_sage_forward(params, z, edge_index, batch_np, x_feat)
    out = jax.block_until_ready(out)

    ref = jax.block_until_ready(
        seal_sage_reference(params, z, edge_index, batch_np, x_feat))
    np.testing.assert_allclose(np.asarray(out), np.asarray(ref),
                               rtol=5e-3, atol=5e-3)
    assert out.shape == (num_graphs, 1)
    print("KERNEL_OK")
</pallas_src>

<mosaic_0001>
module attributes {stable_mosaic.version = 11 : i64} {
  func.func @_sage_conv_kernel(%arg0: i32, %arg1: i32, %arg2: memref<128x128xbf16, #tpu.memory_space<vmem>>, %arg3: memref<128x128xbf16, #tpu.memory_space<vmem>>, %arg4: memref<128x128xbf16, #tpu.memory_space<vmem>>, %arg5: memref<128x128xbf16, #tpu.memory_space<vmem>>, %arg6: memref<128x128xbf16, #tpu.memory_space<vmem>>, %arg7: memref<1x128xbf16, #tpu.memory_space<vmem>>, %arg8: memref<128x128xbf16, #tpu.memory_space<vmem>>, %arg9: memref<128x128xf32, #tpu.memory_space<vmem>>) attributes {dimension_semantics = [#tpu.dimension_semantics<parallel>, #tpu.dimension_semantics<arbitrary>], iteration_bounds = array<i64: 1, 1>, scalar_prefetch = 0 : i64, scratch_operands = 1 : i64, tpu.core_type = #tpu.core_type<tc>, window_params = [{transform_indices = @transform_0, window_bounds = array<i64: 128, 128>}, {transform_indices = @transform_1, window_bounds = array<i64: 128, 128>}, {transform_indices = @transform_2, window_bounds = array<i64: 128, 128>}, {pipeline_mode = #tpu.pipeline_mode<synchronous>, transform_indices = @transform_3, window_bounds = array<i64: 128, 128>}, {pipeline_mode = #tpu.pipeline_mode<synchronous>, transform_indices = @transform_4, window_bounds = array<i64: 128, 128>}, {pipeline_mode = #tpu.pipeline_mode<synchronous>, transform_indices = @transform_5, window_bounds = array<i64: 1, 128>}, {transform_indices = @transform_6, window_bounds = array<i64: 128, 128>}]} {
    %c0_i32 = arith.constant 0 : i32
    %0 = arith.cmpi eq, %arg1, %c0_i32 : i32
    %1 = arith.extui %0 : i1 to i32
    %c0_i32_0 = arith.constant 0 : i32
    %2 = arith.cmpi ne, %1, %c0_i32_0 : i32
    scf.if %2 {
      %cst_10 = arith.constant 0.000000e+00 : f32
      %12 = vector.broadcast %cst_10 : f32 to vector<128x128xf32>
      %c0_11 = arith.constant 0 : index
      %c0_12 = arith.constant 0 : index
      %13 = vector.load %arg9[%c0_11, %c0_12] : memref<128x128xf32, #tpu.memory_space<vmem>>, vector<128x128xf32>
      tpu.vector_store %arg9[%c0_11, %c0_12], %12 {strides = array<i32>} : memref<128x128xf32, #tpu.memory_space<vmem>>, vector<128x128xf32>,
    } else {
    }
    %c0 = arith.constant 0 : index
    %c0_1 = arith.constant 0 : index
    %3 = vector.load %arg9[%c0, %c0_1] : memref<128x128xf32, #tpu.memory_space<vmem>>, vector<128x128xf32>
    %c0_2 = arith.constant 0 : index
    %c0_3 = arith.constant 0 : index
    %4 = vector.load %arg2[%c0_2, %c0_3] : memref<128x128xbf16, #tpu.memory_space<vmem>>, vector<128x128xbf16>
    %c0_4 = arith.constant 0 : index
    %c0_5 = arith.constant 0 : index
    %5 = vector.load %arg3[%c0_4, %c0_5] : memref<128x128xbf16, #tpu.memory_space<vmem>>, vector<128x128xbf16>
    %cst = arith.constant dense<0.000000e+00> : vector<128x128xf32>
    %6 = tpu.matmul %4, %5, %cst {dimension_numbers = #tpu.dot_dimension_numbers<[1], [0], [0], [1], [0, 0, 1, 1], [], []>} : vector<128x128xbf16>, vector<128x128xbf16>, vector<128x128xf32> -> vector<128x128xf32>
    %7 = arith.addf %3, %6 : vector<128x128xf32>
    %c0_6 = arith.constant 0 : index
    %c0_7 = arith.constant 0 : index
    %8 = vector.load %arg9[%c0_6, %c0_7] : memref<128x128xf32, #tpu.memory_space<vmem>>, vector<128x128xf32>
    tpu.vector_store %arg9[%c0_6, %c0_7], %7 {strides = array<i32>} : memref<128x128xf32, #tpu.memory_space<vmem>>, vector<128x128xf32>,
    %c0_i32_8 = arith.constant 0 : i32
    %9 = arith.cmpi eq, %arg1, %c0_i32_8 : i32
    %10 = arith.extui %9 : i1 to i32
    %c0_i32_9 = arith.constant 0 : i32
    %11 = arith.cmpi ne, %10, %c0_i32_9 : i32
    scf.if %11 {
      %c0_10 = arith.constant 0 : index
      %c0_11 = arith.constant 0 : index
      %12 = vector.load %arg9[%c0_10, %c0_11] : memref<128x128xf32, #tpu.memory_space<vmem>>, vector<128x128xf32>
      %13 = arith.truncf %12 : vector<128x128xf32> to vector<128x128xbf16>
      %c0_12 = arith.constant 0 : index
      %c0_13 = arith.constant 0 : index
      %14 = vector.load %arg5[%c0_12, %c0_13] : memref<128x128xbf16, #tpu.memory_space<vmem>>, vector<128x128xbf16>
      %cst_14 = arith.constant dense<0.000000e+00> : vector<128x128xf32>
      %15 = tpu.matmul %13, %14, %cst_14 {dimension_numbers = #tpu.dot_dimension_numbers<[1], [0], [0], [1], [0, 0, 1, 1], [], []>} : vector<128x128xbf16>, vector<128x128xbf16>, vector<128x128xf32> -> vector<128x128xf32>
      %c0_15 = arith.constant 0 : index
      %c0_16 = arith.constant 0 : index
      %16 = vector.load %arg4[%c0_15, %c0_16] : memref<128x128xbf16, #tpu.memory_space<vmem>>, vector<128x128xbf16>
      %c0_17 = arith.constant 0 : index
      %c0_18 = arith.constant 0 : index
      %17 = vector.load %arg6[%c0_17, %c0_18] : memref<128x128xbf16, #tpu.memory_space<vmem>>, vector<128x128xbf16>
      %cst_19 = arith.constant dense<0.000000e+00> : vector<128x128xf32>
      %18 = tpu.matmul %16, %17, %cst_19 {dimension_numbers = #tpu.dot_dimension_numbers<[1], [0], [0], [1], [0, 0, 1, 1], [], []>} : vector<128x128xbf16>, vector<128x128xbf16>, vector<128x128xf32> -> vector<128x128xf32>
      %19 = arith.addf %15, %18 : vector<128x128xf32>
      %c0_20 = arith.constant 0 : index
      %c0_21 = arith.constant 0 : index
      %20 = vector.load %arg7[%c0_20, %c0_21] : memref<1x128xbf16, #tpu.memory_space<vmem>>, vector<1x128xbf16>
      %21 = arith.extf %20 : vector<1x128xbf16> to vector<1x128xf32>
      %22 = vector.broadcast %21 : vector<1x128xf32> to vector<128x128xf32>
      %23 = arith.addf %19, %22 : vector<128x128xf32>
      %cst_22 = arith.constant 0.000000e+00 : f32
      %24 = vector.broadcast %cst_22 : f32 to vector<128x128xf32>
      %25 = arith.maximumf %23, %24 : vector<128x128xf32>
      %26 = arith.truncf %25 : vector<128x128xf32> to vector<128x128xbf16>
      %c0_23 = arith.constant 0 : index
      %c0_24 = arith.constant 0 : index
      %27 = vector.load %arg8[%c0_23, %c0_24] : memref<128x128xbf16, #tpu.memory_space<vmem>>, vector<128x128xbf16>
      tpu.vector_store %arg8[%c0_23, %c0_24], %26 {strides = array<i32>} : memref<128x128xbf16, #tpu.memory_space<vmem>>, vector<128x128xbf16>,
    } else {
    }
    return
  }
  func.func @transform_0(%arg0: i32, %arg1: i32) -> (i32, i32) {
    %c0_i32 = arith.constant 0 : i32
    return %arg0, %arg1 : i32, i32
  }
  func.func @transform_1(%arg0: i32, %arg1: i32) -> (i32, i32) {
    %c0_i32 = arith.constant 0 : i32
    %c0_i32_0 = arith.constant 0 : i32
    return %arg1, %c0_i32 : i32, i32
  }
  func.func @transform_2(%arg0: i32, %arg1: i32) -> (i32, i32) {
    %c0_i32 = arith.constant 0 : i32
    %c0_i32_0 = arith.constant 0 : i32
    return %arg0, %c0_i32 : i32, i32
  }
  func.func @transform_3(%arg0: i32, %arg1: i32) -> (i32, i32) {
    %c0_i32 = arith.constant 0 : i32
    %c0_i32_0 = arith.constant 0 : i32
    %c0_i32_1 = arith.constant 0 : i32
    return %c0_i32, %c0_i32_0 : i32, i32
  }
  func.func @transform_4(%arg0: i32, %arg1: i32) -> (i32, i32) {
    %c0_i32 = arith.constant 0 : i32
    %c0_i32_0 = arith.constant 0 : i32
    %c0_i32_1 = arith.constant 0 : i32
    return %c0_i32, %c0_i32_0 : i32, i32
  }
  func.func @transform_5(%arg0: i32, %arg1: i32) -> (i32, i32) {
    %c0_i32 = arith.constant 0 : i32
    %c0_i32_0 = arith.constant 0 : i32
    %c0_i32_1 = arith.constant 0 : i32
    return %c0_i32, %c0_i32_0 : i32, i32
  }
  func.func @transform_6(%arg0: i32, %arg1: i32) -> (i32, i32) {
    %c0_i32 = arith.constant 0 : i32
    %c0_i32_0 = arith.constant 0 : i32
    return %arg0, %c0_i32 : i32, i32
  }
}

</mosaic_0001>

<bundles_post_ra>
// kernel: tpu_custom_call.1
= control target key start
LH: loop header
LB: loop body
LE: loop exit
PB: predicated region body
PF: predicated region fallthrough
CT: control target
= control target key end

     0   :  { %11 = vsyncpa [#allocation4], 0  ;;  %s1283_s0 = inlined_call_operand.hbm [shape: bf16[128,128], index: 0, kind: input, shape index: {}]   ;;  %s1284_s1 = inlined_call_operand.hbm [shape: bf16[128,128], index: 1, kind: input, shape index: {}]   ;;  %s1285_s2 = inlined_call_operand.hbm [shape: bf16[128,128], index: 2, kind: input, shape index: {}]   ;;  %s1286_s3 = inlined_call_operand.hbm [shape: bf16[128,128], index: 3, kind: input, shape index: {}]   ;;  %s1287_s4 = inlined_call_operand.hbm [shape: bf16[128,128], index: 4, kind: input, shape index: {}]   ;;  %s1288_s5 = inlined_call_operand.vmem [shape: bf16[1,128], index: 5, kind: input, shape index: {}]   ;;  %s1289_s6 = inlined_call_operand.hbm [shape: bf16[128,128], index: 6, kind: output, shape index: {}]  }
   0x1   :  { %12 = vsyncpa [#allocation7], 0 }
   0x2   :  { %13 = vsyncpa [#allocation10], 0 }
   0x3   :  { %14 = vsyncpa [#allocation5], 0  ;;  %s32_s23 = sshll.u32 %s1284_s1, 4  ;;  %s1183_s24 = smov [#allocation6]   ;;  %s33_s23 = int_to_ptr.hbm [resolvable:$true] %s32_s23 }
   0x4   :  { %s34_s25 = sshll.u32 %s1183_s24, 4  ;;  %s58_s28 = sshll.u32 %s1286_s3, 4  ;;  %s35_s25 = int_to_ptr.vmem [resolvable:$true] %s34_s25  ;;  %s59_s28 = int_to_ptr.hbm [resolvable:$true] %s58_s28 }
   0x5   :  { %s1184_s29 = smov 64   ;;  %s1185_s30 = smov 4  }
   0x6   :  { %40 = dma.hbm_to_vmem [thread:$0]  %s33_s23, 1024, %s35_s25, [#allocation7], %s1184_s29, %s1184_s29, %s1185_s30  }
   0x7   :  { %s1186_s7 = smov [#allocation9]   ;;  %s19_s1 = sshll.u32 %s1283_s0, 4  ;;  %s20_s1 = int_to_ptr.hbm [resolvable:$true] %s19_s1 }
   0x8   :  { %s60_s8 = sshll.u32 %s1186_s7, 4  ;;  %s45_s12 = sshll.u32 %s1285_s2, 4  ;;  %s61_s8 = int_to_ptr.vmem [resolvable:$true] %s60_s8  ;;  %s46_s12 = int_to_ptr.hbm [resolvable:$true] %s45_s12 }
   0x9   :  { %66 = dma.hbm_to_vmem [thread:$0]  %s59_s28, 1024, %s61_s8, [#allocation10], %s1184_s29, %s1184_s29, %s1185_s30  }
   0xa   :  { %s1187_s13 = smov [#allocation3]   ;;  %s1188_s15 = smov [#allocation8]  }
   0xb   :  { %s21_s14 = sshll.u32 %s1187_s13, 4  ;;  %s47_s0 = sshll.u32 %s1188_s15, 4  ;;  %s22_s14 = int_to_ptr.vmem [resolvable:$true] %s21_s14  ;;  %s48_s0 = int_to_ptr.vmem [resolvable:$true] %s47_s0 }
   0xc   :  { %27 = dma.hbm_to_vmem [thread:$0]  %s20_s1, 1024, %s22_s14, [#allocation4], %s1184_s29, %s1184_s29, %s1185_s30  }
   0xd   :  { %s71_s18 = sshll.u32 %s1287_s4, 4  ;;  %s1189_s2 = smov [#allocation11]   ;;  %s72_s18 = int_to_ptr.hbm [resolvable:$true] %s71_s18 }
   0xe   :  { %53 = dma.hbm_to_vmem [thread:$0]  %s46_s12, 1024, %s48_s0, [#allocation7], %s1184_s29, %s1184_s29, %s1185_s30  }
   0xf   :  { %s73_s19 = sshll.u32 %s1189_s2, 4  ;;  %s74_s19 = int_to_ptr.vmem [resolvable:$true] %s73_s19 }
  0x10   :  { %79 = dma.hbm_to_vmem [thread:$0]  %s72_s18, 1024, %s74_s19, [#allocation10], %s1184_s29, %s1184_s29, %s1185_s30  }
  0x11   :  { %1175 = dma.done.wait [#allocation4], 1024  }
  0x12   :  { %1176 = vsyncadd [#allocation4], 4294966272 }
  0x13   :  { %1177 = dma.done.wait [#allocation7], 2048  }
  0x14   :  { %1178 = vsyncadd [#allocation7], 4294965248 }
  0x15   :  { %1179 = dma.done.wait [#allocation10], 2048  }
  0x16   :  { %1180 = vsyncadd [#allocation10], 4294965248  ;;  %v927_v0 = vld [vmem:[#allocation6 + $0x38] sm:$0xff]  ;;  %v926_v1 = vld [vmem:[#allocation6 + $0x30] sm:$0xff]  ;;  %s737_s24 = sshll.u32 %s1289_s6, 4  ;;  %s738_s24 = int_to_ptr.hbm [resolvable:$true] %s737_s24 }
  0x17   :  { %266 = vmatpush.bf16.msra.mxu0 %v927_v0  ;;  %999 = vmatpush.bf16.msra.mxu3 %v927_v0  ;;  %v925_v2 = vld [vmem:[#allocation6 + $0x28] sm:$0xff]  ;;  %v924_v3 = vld [vmem:[#allocation6 + $0x20] sm:$0xff]  ;;  %v923_v4 = vld [vmem:[#allocation6 + $0x18] sm:$0xff] }
  0x18   :  { %v922_v5 = vld [vmem:[#allocation6 + $0x10] sm:$0xff]  ;;  %v921_v6 = vld [vmem:[#allocation6 + $0x8] sm:$0xff]  ;;  %v920_v7 = vld [vmem:[#allocation6] sm:$0xff] }
  0x19   :  { %v912_v8 = vld [vmem:[#allocation3] sm:$0xff]  ;;  %v918_v9 = vld [vmem:[#allocation3 + $0x30] sm:$0xff]  ;;  %v913_v10 = vld [vmem:[#allocation3 + $0x8] sm:$0xff] }
  0x1a   :  { %v919_v11 = vld [vmem:[#allocation3 + $0x38] sm:$0xff]  ;;  %v914_v12 = vld [vmem:[#allocation3 + $0x10] sm:$0xff]  ;;  %v949_v18 = vld [vmem:[#allocation11 + $0x28] sm:$0xff] }
  0x1b   :  { %267 = vmatpush.bf16.msra.mxu0 %v926_v1  ;;  %1000 = vmatpush.bf16.msra.mxu3 %v926_v1  ;;  %v915_v13 = vld [vmem:[#allocation3 + $0x18] sm:$0xff]  ;;  %v950_v16 = vld [vmem:[#allocation11 + $0x30] sm:$0xff]  ;;  %v933_v19 = vld [vmem:[#allocation9 + $0x28] sm:$0xff] }
  0x1c   :  { %v951_v14 = vld [vmem:[#allocation11 + $0x38] sm:$0xff]  ;;  %v934_v17 = vld [vmem:[#allocation9 + $0x30] sm:$0xff]  ;;  %v948_v20 = vld [vmem:[#allocation11 + $0x20] sm:$0xff] }
  0x1d   :  { %v935_v15 = vld [vmem:[#allocation9 + $0x38] sm:$0xff]  ;;  %518 = vmatpush.bf16.msra.mxu1 %v951_v14  ;;  %v932_v21 = vld [vmem:[#allocation9 + $0x20] sm:$0xff]  ;;  %v946_v25 = vld [vmem:[#allocation11 + $0x10] sm:$0xff] }
  0x1e   :  { %615 = vmatpush.bf16.msra.mxu2 %v935_v15  ;;  %v916_v22 = vld [vmem:[#allocation3 + $0x20] sm:$0xff]  ;;  %v947_v23 = vld [vmem:[#allocation11 + $0x18] sm:$0xff]  ;;  %v945_v26 = vld [vmem:[#allocation11 + $0x8] sm:$0xff] }
  0x1f   :  { %268 = vmatpush.bf16.msra.mxu0 %v925_v2  ;;  %1001 = vmatpush.bf16.msra.mxu3 %v925_v2  ;;  %v931_v24 = vld [vmem:[#allocation9 + $0x18] sm:$0xff]  ;;  %v917_v27 = vld [vmem:[#allocation3 + $0x28] sm:$0xff]  ;;  %v944_v28 = vld [vmem:[#allocation11] sm:$0xff] }
  0x20   :  { %v930_v29 = vld [vmem:[#allocation9 + $0x10] sm:$0xff]  ;;  %v929_v31 = vld [vmem:[#allocation9 + $0x8] sm:$0xff]  ;;  %v928_v32 = vld [vmem:[#allocation9] sm:$0xff] }
  0x21   :  { %519 = vmatpush.bf16.msra.mxu1 %v950_v16  ;;  %v942_v30 = vld [vmem:[#allocation8 + $0x30] sm:$0xff]  ;;  %v936_v33 = vld [vmem:[#allocation8] sm:$0xff]  ;;  %v943_v34 = vld [vmem:[#allocation8 + $0x38] sm:$0xff] }
  0x22   :  { %616 = vmatpush.bf16.msra.mxu2 %v934_v17  ;;  %v937_v35 = vld [vmem:[#allocation8 + $0x8] sm:$0xff]  ;;  %v938_v38 = vld [vmem:[#allocation8 + $0x10] sm:$0xff]  ;;  %v939_v45 = vld [vmem:[#allocation8 + $0x18] sm:$0xff] }
  0x23   :  { %269 = vmatpush.bf16.msra.mxu0 %v924_v3  ;;  %1002 = vmatpush.bf16.msra.mxu3 %v924_v3  ;;  %v940_v51 = vld [vmem:[#allocation8 + $0x20] sm:$0xff]  ;;  %v941_v55 = vld [vmem:[#allocation8 + $0x28] sm:$0xff] }
  0x25   :  { %520 = vmatpush.bf16.msra.mxu1 %v949_v18 }
  0x26   :  { %617 = vmatpush.bf16.msra.mxu2 %v933_v19 }
  0x27   :  { %270 = vmatpush.bf16.msra.mxu0 %v923_v4  ;;  %1003 = vmatpush.bf16.msra.mxu3 %v923_v4 }
  0x29   :  { %521 = vmatpush.bf16.msra.mxu1 %v948_v20 }
  0x2a   :  { %618 = vmatpush.bf16.msra.mxu2 %v932_v21 }
  0x2b   :  { %271 = vmatpush.bf16.msra.mxu0 %v922_v5  ;;  %1004 = vmatpush.bf16.msra.mxu3 %v922_v5 }
  0x2d   :  { %522 = vmatpush.bf16.msra.mxu1 %v947_v23 }
  0x2e   :  { %619 = vmatpush.bf16.msra.mxu2 %v931_v24 }
  0x2f   :  { %272 = vmatpush.bf16.msra.mxu0 %v921_v6  ;;  %1005 = vmatpush.bf16.msra.mxu3 %v921_v6  ;;  %v664_v6 = vld [vmem:[%s1288_s5] sm:$0x1]  ;;  %s1190_s5 = smov [#allocation12]  }
  0x30   :  { %s735_s21 = sshll.u32 %s1190_s5, 4  ;;  %s736_s21 = int_to_ptr.vmem [resolvable:$true] %s735_s21 }
  0x31   :  { %523 = vmatpush.bf16.msra.mxu1 %v946_v25 }
  0x32   :  { %620 = vmatpush.bf16.msra.mxu2 %v930_v29 }
  0x33   :  { %273 = vmatpush.bf16.msra.mxu0 %v920_v7  ;;  %1006 = vmatpush.bf16.msra.mxu3 %v920_v7 }
  0x35   :  { %524 = vmatpush.bf16.msra.mxu1 %v945_v26 }
  0x36   :  { %274 = vmatmul.bf16.vlgmr.msra.gmra.mxu0 %v912_v8  ;;  %304 = vmatmul.bf16.vlgmr.msra.gmra.mxu3 %v918_v9  ;;  %v665_v9 = vunpack.c.l.bf16 %v664_v6 }
  0x37   :  { %1007 = vmatpush.bf16.msrb.mxu3 %v951_v14  ;;  %621 = vmatpush.bf16.msra.mxu2 %v929_v31 }
  0x39   :  { %525 = vmatpush.bf16.msra.mxu1 %v944_v28 }
  0x3b   :  { %1008 = vmatpush.bf16.msrb.mxu3 %v950_v16  ;;  %622 = vmatpush.bf16.msra.mxu2 %v928_v32 }
  0x3c   :  { %526 = vmatmul.bf16.vlgmr.msra.gmra.mxu1 %v936_v33 }
  0x3f   :  { %1009 = vmatpush.bf16.msrb.mxu3 %v949_v18 }
  0x43   :  { %1010 = vmatpush.bf16.msrb.mxu3 %v948_v20 }
  0x46   :  { %279 = vmatmul.bf16.gmra.mxu0 %v913_v10  ;;  %309 = vmatmul.bf16.gmra.mxu3 %v919_v11  ;;  %v1259_v11 = vperm.slane %v665_v9, 0 }
  0x47   :  { %1011 = vmatpush.bf16.msrb.mxu3 %v947_v23 }
  0x4b   :  { %1012 = vmatpush.bf16.msrb.mxu3 %v946_v25 }
  0x4c   :  { %531 = vmatmul.bf16.gmra.mxu1 %v937_v35 }
  0x4f   :  { %1013 = vmatpush.bf16.msrb.mxu3 %v945_v26 }
  0x53   :  { %1014 = vmatpush.bf16.msrb.mxu3 %v944_v28 }
  0x56   :  { %284 = vmatmul.bf16.gmra.mxu0 %v914_v12  ;;  %556 = vmatmul.bf16.vlgmr.msrb.gmra.mxu3 %v942_v30 }
  0x57   :  { %1015 = vmatpush.bf16.msra.mxu3 %v935_v15 }
  0x5b   :  { %1016 = vmatpush.bf16.msra.mxu3 %v934_v17 }
  0x5c   :  { %536 = vmatmul.bf16.gmra.mxu1 %v938_v38 }
  0x5f   :  { %1017 = vmatpush.bf16.msra.mxu3 %v933_v19 }
  0x63   :  { %1018 = vmatpush.bf16.msra.mxu3 %v932_v21 }
  0x66   :  { %289 = vmatmul.bf16.gmra.mxu0 %v915_v13  ;;  %561 = vmatmul.bf16.gmra.mxu3 %v943_v34 }
  0x67   :  { %1019 = vmatpush.bf16.msra.mxu3 %v931_v24 }
  0x6b   :  { %1020 = vmatpush.bf16.msra.mxu3 %v930_v29 }
  0x6c   :  { %541 = vmatmul.bf16.gmra.mxu1 %v939_v45 }
  0x6f   :  { %1021 = vmatpush.bf16.msra.mxu3 %v929_v31 }
  0x73   :  { %1022 = vmatpush.bf16.msra.mxu3 %v928_v32 }
  0x76   :  { %294 = vmatmul.bf16.gmra.mxu0 %v916_v22 }
  0x7c   :  { %546 = vmatmul.bf16.gmra.mxu1 %v940_v51 }
  0x86   :  { %299 = vmatmul.bf16.gmra.mxu0 %v917_v27 }
  0x8c   :  { %551 = vmatmul.bf16.gmra.mxu1 %v941_v55 }
  0xb3   :  { %v275_v36 = vpop.f32.mrf.mxu0 }
  0xb9   :  { %v305_v37 = vpop.f32.mrf.mxu3  ;;  %v527_v2 = vpop.f32.mrf.mxu1 }
  0xbb   :  { %v277_v39 = vpop.f32.mrf.mxu0 }
  0xbc   :  { %v366_v40 = vpack.c.bf16 %v277_v39, %v275_v36 }
  0xbe   :  { %623 = vmatmul.bf16.vlgmr.msra.gmra.mxu2 %v366_v40 }
  0xc1   :  { %v307_v41 = vpop.f32.mrf.mxu3  ;;  %v529_v4 = vpop.f32.mrf.mxu1 }
  0xc2   :  { %v372_v42 = vpack.c.bf16 %v307_v41, %v305_v37 }
  0xc3   :  { %v280_v43 = vpop.f32.mrf.mxu0 }
  0xc4   :  { %653 = vmatmul.bf16.vlgmr.msra.gmra.mxu3 %v372_v42 }
  0xc9   :  { %v310_v44 = vpop.f32.mrf.mxu3  ;;  %v532_v7 = vpop.f32.mrf.mxu1 }
  0xcb   :  { %v282_v46 = vpop.f32.mrf.mxu0 }
  0xcc   :  { %v367_v47 = vpack.c.bf16 %v282_v46, %v280_v43 }
  0xce   :  { %628 = vmatmul.bf16.gmra.mxu2 %v367_v47 }
  0xd1   :  { %v312_v48 = vpop.f32.mrf.mxu3  ;;  %v534_v14 = vpop.f32.mrf.mxu1 }
  0xd2   :  { %v373_v49 = vpack.c.bf16 %v312_v48, %v310_v44 }
  0xd3   :  { %v285_v50 = vpop.f32.mrf.mxu0 }
  0xd4   :  { %658 = vmatmul.bf16.gmra.mxu3 %v373_v49 }
  0xd9   :  { %v557_v0 = vpop.f32.mrf.mxu3  ;;  %v537_v28 = vpop.f32.mrf.mxu1 }
  0xdb   :  { %v287_v52 = vpop.f32.mrf.mxu0 }
  0xdc   :  { %v368_v53 = vpack.c.bf16 %v287_v52, %v285_v50 }
  0xde   :  { %633 = vmatmul.bf16.gmra.mxu2 %v368_v53 }
  0xe1   :  { %v559_v1 = vpop.f32.mrf.mxu3  ;;  %v539_v38 = vpop.f32.mrf.mxu1 }
  0xe3   :  { %v290_v54 = vpop.f32.mrf.mxu0 }
  0xe9   :  { %v562_v3 = vpop.f32.mrf.mxu3  ;;  %v542_v51 = vpop.f32.mrf.mxu1 }
  0xeb   :  { %v292_v56 = vpop.f32.mrf.mxu0 }
  0xec   :  { %v369_v57 = vpack.c.bf16 %v292_v56, %v290_v54 }
  0xee   :  { %638 = vmatmul.bf16.gmra.mxu2 %v369_v57 }
  0xf1   :  { %v564_v5 = vpop.f32.mrf.mxu3 }
  0xf3   :  { %v295_v58 = vpop.f32.mrf.mxu0 }
  0xfb   :  { %v297_v59 = vpop.f32.mrf.mxu0 }
  0xfc   :  { %v370_v60 = vpack.c.bf16 %v297_v59, %v295_v58  ;;  %v544_v59 = vpop.f32.mrf.mxu1 }
  0xfe   :  { %643 = vmatmul.bf16.gmra.mxu2 %v370_v60 }
 0x103   :  { %v300_v61 = vpop.f32.mrf.mxu0 }
 0x10b   :  { %v302_v62 = vpop.f32.mrf.mxu0 }
 0x10c   :  { %v371_v63 = vpack.c.bf16 %v302_v62, %v300_v61 }
 0x10e   :  { %648 = vmatmul.bf16.gmra.mxu2 %v371_v63 }
 0x141   :  { %v624_v8 = vpop.f32.mrf.mxu2 }
 0x142   :  { %v625_v10 = vadd.f32 %v624_v8, %v527_v2 }
 0x144   :  { %v667_v15 = vadd.f32 %v1259_v11, %v625_v10 }
 0x146   :  { %v683_v19 = vmax.f32 %v667_v15, 0.0 }
 0x147   :  { %v654_v12 = vpop.f32.mrf.mxu3 }
 0x148   :  { %v655_v17 = vadd.f32 %v654_v12, %v557_v0 }
 0x149   :  { %v626_v13 = vpop.f32.mrf.mxu2 }
 0x14a   :  { %v627_v16 = vadd.f32 %v626_v13, %v529_v4  ;;  %v679_v21 = vadd.f32 %v1259_v11, %v655_v17 }
 0x14c   :  { %v668_v18 = vadd.f32 %v1259_v11, %v627_v16  ;;  %v695_v26 = vmax.f32 %v679_v21, 0.0 }
 0x14e   :  { %v684_v20 = vmax.f32 %v668_v18, 0.0 }
 0x14f   :  { %v656_v22 = vpop.f32.mrf.mxu3 }
 0x150   :  { %v955_v23 = vpack.c.bf16 %v684_v20, %v683_v19  ;;  %v657_v24 = vadd.f32 %v656_v22, %v559_v1  ;;  %v547_v1 = vpop.f32.mrf.mxu1 }
 0x151   :  { %v629_v25 = vpop.f32.mrf.mxu2 }
 0x152   :  { %956 = vst [vmem:[#allocation12] sm:$0xff] %v955_v23   ;;  %v680_v27 = vadd.f32 %v1259_v11, %v657_v24  ;;  %v630_v30 = vadd.f32 %v629_v25, %v532_v7 }
 0x154   :  { %v696_v29 = vmax.f32 %v680_v27, 0.0  ;;  %v669_v34 = vadd.f32 %v1259_v11, %v630_v30 }
 0x156   :  { %v985_v31 = vpack.c.bf16 %v696_v29, %v695_v26  ;;  %v685_v39 = vmax.f32 %v669_v34, 0.0 }
 0x157   :  { %v659_v32 = vpop.f32.mrf.mxu3 }
 0x158   :  { %997 = vst [vmem:[#allocation12 + $0x30] sm:$0xff] %v985_v31   ;;  %v660_v36 = vadd.f32 %v659_v32, %v562_v3  ;;  %v549_v7 = vpop.f32.mrf.mxu1 }
 0x159   :  { %v631_v33 = vpop.f32.mrf.mxu2 }
 0x15a   :  { %v632_v35 = vadd.f32 %v631_v33, %v534_v14  ;;  %v681_v41 = vadd.f32 %v1259_v11, %v660_v36 }
 0x15c   :  { %v670_v37 = vadd.f32 %v1259_v11, %v632_v35  ;;  %v697_v46 = vmax.f32 %v681_v41, 0.0 }
 0x15e   :  { %v686_v40 = vmax.f32 %v670_v37, 0.0 }
 0x15f   :  { %v661_v42 = vpop.f32.mrf.mxu3 }
 0x160   :  { %v960_v43 = vpack.c.bf16 %v686_v40, %v685_v39  ;;  %v662_v44 = vadd.f32 %v661_v42, %v564_v5  ;;  %v552_v16 = vpop.f32.mrf.mxu1 }
 0x161   :  { %v634_v45 = vpop.f32.mrf.mxu2 }
 0x162   :  { %992 = vst [vmem:[#allocation12 + $0x8] sm:$0xff] %v960_v43   ;;  %v682_v47 = vadd.f32 %v1259_v11, %v662_v44  ;;  %v635_v49 = vadd.f32 %v634_v45, %v537_v28 }
 0x164   :  { %v698_v48 = vmax.f32 %v682_v47, 0.0  ;;  %v671_v53 = vadd.f32 %v1259_v11, %v635_v49 }
 0x166   :  { %v990_v50 = vpack.c.bf16 %v698_v48, %v697_v46  ;;  %v687_v56 = vmax.f32 %v671_v53, 0.0 }
 0x168   :  { %998 = vst [vmem:[#allocation12 + $0x38] sm:$0xff] %v990_v50   ;;  %v554_v20 = vpop.f32.mrf.mxu1 }
 0x169   :  { %v636_v52 = vpop.f32.mrf.mxu2 }
 0x16a   :  { %v637_v54 = vadd.f32 %v636_v52, %v539_v38 }
 0x16c   :  { %v672_v55 = vadd.f32 %v1259_v11, %v637_v54 }
 0x16e   :  { %v688_v57 = vmax.f32 %v672_v55, 0.0 }
 0x170   :  { %v965_v58 = vpack.c.bf16 %v688_v57, %v687_v56 }
 0x171   :  { %v639_v60 = vpop.f32.mrf.mxu2 }
 0x172   :  { %993 = vst [vmem:[#allocation12 + $0x10] sm:$0xff] %v965_v58   ;;  %v640_v61 = vadd.f32 %v639_v60, %v542_v51 }
 0x174   :  { %v673_v63 = vadd.f32 %v1259_v11, %v640_v61 }
 0x176   :  { %v689_v3 = vmax.f32 %v673_v63, 0.0 }
 0x179   :  { %v641_v62 = vpop.f32.mrf.mxu2 }
 0x17a   :  { %v642_v0 = vadd.f32 %v641_v62, %v544_v59 }
 0x17c   :  { %v674_v2 = vadd.f32 %v1259_v11, %v642_v0 }
 0x17e   :  { %v690_v4 = vmax.f32 %v674_v2, 0.0 }
 0x180   :  { %v970_v5 = vpack.c.bf16 %v690_v4, %v689_v3 }
 0x181   :  { %v644_v6 = vpop.f32.mrf.mxu2 }
 0x182   :  { %994 = vst [vmem:[#allocation12 + $0x18] sm:$0xff] %v970_v5   ;;  %v645_v8 = vadd.f32 %v644_v6, %v547_v1 }
 0x184   :  { %v675_v10 = vadd.f32 %v1259_v11, %v645_v8 }
 0x186   :  { %v691_v14 = vmax.f32 %v675_v10, 0.0 }
 0x189   :  { %v646_v9 = vpop.f32.mrf.mxu2 }
 0x18a   :  { %v647_v12 = vadd.f32 %v646_v9, %v549_v7 }
 0x18c   :  { %v676_v13 = vadd.f32 %v1259_v11, %v647_v12 }
 0x18e   :  { %v692_v15 = vmax.f32 %v676_v13, 0.0 }
 0x190   :  { %v975_v17 = vpack.c.bf16 %v692_v15, %v691_v14 }
 0x191   :  { %v649_v18 = vpop.f32.mrf.mxu2 }
 0x192   :  { %995 = vst [vmem:[#allocation12 + $0x20] sm:$0xff] %v975_v17   ;;  %v650_v19 = vadd.f32 %v649_v18, %v552_v16 }
 0x194   :  { %v677_v22 = vadd.f32 %v1259_v11, %v650_v19 }
 0x196   :  { %v693_v25 = vmax.f32 %v677_v22, 0.0 }
 0x199   :  { %v651_v21 = vpop.f32.mrf.mxu2 }
 0x19a   :  { %v652_v23 = vadd.f32 %v651_v21, %v554_v20 }
 0x19c   :  { %v678_v24 = vadd.f32 %v1259_v11, %v652_v23 }
 0x19e   :  { %v694_v26 = vmax.f32 %v678_v24, 0.0 }
 0x1a0   :  { %v980_v27 = vpack.c.bf16 %v694_v26, %v693_v25 }
 0x1a2   :  { %996 = vst [vmem:[#allocation12 + $0x28] sm:$0xff] %v980_v27  }
 0x1a3   :  { %743 = dma.vmem_to_hbm [thread:$0]  %s736_s21, 1024, %s738_s24, [#allocation5], %s1184_s29, %s1184_s29, %s1185_s30  }
 0x1a4   :  { %1181 = dma.done.wait [#allocation5], 1024  }
 0x1a5   :  { %1182 = vsyncadd [#allocation5], 4294966272 }
 0x1a6   :  { %748 = vsyncpa [#allocation4], 1 }
 0x1a7   :  { %749 = vsyncpa [#allocation7], 1 }
 0x1a8   :  { %750 = vsyncpa [#allocation10], 1 }
 0x1a9   :  { %751 = vsyncpa [#allocation5], 1 }

</bundles_post_ra>
